<compile_context>
chip_gen: v5e
topology: v5e:2x2
jax: 0.10.0
libtpu: 0.0.40
codegen_flags: <defaults>
</compile_context>

<pallas_src>
import functools

import jax
import jax.numpy as jnp
from jax.experimental import pallas as pl
from jax.experimental.pallas import tpu as pltpu


def _fused_share_kernel(xb_ref, xm_ref, w1_ref, w2_ref, b1_ref, b2_ref,
                        ob_ref, om_ref):
    # xb/xm: (tm, D) f32 activation tiles; w: (D, D) f32 in [in, out] layout;
    # b: (1, D) f32; outputs (tm, D).  bf16 cast happens here (not in XLA).
    yb = jnp.dot(xb_ref[...].astype(jnp.bfloat16),
                 w1_ref[...].astype(jnp.bfloat16),
                 preferred_element_type=jnp.float32)
    ob_ref[...] = (yb + b1_ref[...]).astype(ob_ref.dtype)
    ym = jnp.dot(xm_ref[...].astype(jnp.bfloat16),
                 w2_ref[...].astype(jnp.bfloat16),
                 preferred_element_type=jnp.float32)
    om_ref[...] = (ym + b2_ref[...]).astype(om_ref.dtype)


def _single_bridge_kernel(x_ref, w_ref, b_ref, o_ref):
    y = jnp.dot(x_ref[...].astype(jnp.bfloat16),
                w_ref[...].astype(jnp.bfloat16),
                preferred_element_type=jnp.float32)
    o_ref[...] = (y + b_ref[...]).astype(o_ref.dtype)


def _pick_tm(B, tm_max):
    # Full-batch block when it fits (block == full dim, so no (8,128) issue
    # even for odd B); otherwise tm_max (a multiple of 8) with the partial
    # last block masked by Pallas.
    return B if B <= tm_max else tm_max


def _linear_pallas(x, w_t, b, out_dtype, tm_max):
    """One exact-shaped bridge: x[B, D] @ w_t[D, D] + b[1, D]."""
    B, D = x.shape
    tm = _pick_tm(B, tm_max)
    grid = (pl.cdiv(B, tm),)
    itemsize = jnp.dtype(x.dtype).itemsize
    bytes_accessed = (x.size * itemsize + w_t.size * 4 + b.size * 4
                      + B * D * jnp.dtype(out_dtype).itemsize)
    return pl.pallas_call(
        _single_bridge_kernel,
        out_shape=jax.ShapeDtypeStruct((B, D), out_dtype),
        grid=grid,
        in_specs=[
            pl.BlockSpec((tm, D), lambda i: (i, 0)),   # activations stream
            pl.BlockSpec((D, D), lambda i: (0, 0)),    # weight, VMEM-resident
            pl.BlockSpec((1, D), lambda i: (0, 0)),    # bias, VMEM-resident
        ],
        out_specs=pl.BlockSpec((tm, D), lambda i: (i, 0)),
        compiler_params=pltpu.CompilerParams(dimension_semantics=("parallel",)),
        cost_estimate=pl.CostEstimate(flops=2 * B * D * D, transcendentals=0,
                                      bytes_accessed=bytes_accessed),
    )(x, w_t, b)


@functools.partial(jax.jit, static_argnames=("tm_max", "out_dtype"))
def share_layer(book_user_embeddings, movie_user_embeddings,
                w1, b1, w2, b2, *, tm_max=1024, out_dtype=None):
    """Pallas implementation of ShareLayer.forward.

    book_user_embeddings:  [Bb, D]
    movie_user_embeddings: [Bm, D]
    w1, w2: [D, D]  (PyTorch Linear layout: [out_features, in_features])
    b1, b2: [D] or [1, D]
    Returns (bridge1(book), bridge2(movie)); dtype = input dtype unless
    out_dtype is given (e.g. jnp.bfloat16 to halve writeback traffic).
    """
    Bb, D = book_user_embeddings.shape
    Bm, Dm = movie_user_embeddings.shape
    assert D == Dm and w1.shape == (D, D) and w2.shape == (D, D)
    assert tm_max % 8 == 0
    out_dtype = jnp.dtype(out_dtype) if out_dtype is not None \
        else book_user_embeddings.dtype

    # One-time tiny layout plumbing (weights only — D*D elements, negligible):
    # transpose to [in, out] so the kernel computes x @ W with no XLU transpose.
    w1t = w1.T.astype(jnp.float32)
    w2t = w2.T.astype(jnp.float32)
    b1r = jnp.reshape(b1, (1, D)).astype(jnp.float32)
    b2r = jnp.reshape(b2, (1, D)).astype(jnp.float32)

    if Bb == Bm:
        # Fused path: both bridges in one pallas_call, one grid step per batch
        # tile (single step at small batch -> minimal launch/step overhead).
        B = Bb
        tm = _pick_tm(B, tm_max)
        grid = (pl.cdiv(B, tm),)
        itemsize = jnp.dtype(book_user_embeddings.dtype).itemsize
        bytes_accessed = (2 * B * D * itemsize                       # act reads
                          + 2 * D * D * 4 + 2 * D * 4                # weights/bias
                          + 2 * B * D * jnp.dtype(out_dtype).itemsize)  # writes
        book_out, movie_out = pl.pallas_call(
            _fused_share_kernel,
            out_shape=(jax.ShapeDtypeStruct((B, D), out_dtype),
                       jax.ShapeDtypeStruct((B, D), out_dtype)),
            grid=grid,
            in_specs=[
                pl.BlockSpec((tm, D), lambda i: (i, 0)),   # book activations
                pl.BlockSpec((tm, D), lambda i: (i, 0)),   # movie activations
                pl.BlockSpec((D, D), lambda i: (0, 0)),    # w1 (resident)
                pl.BlockSpec((D, D), lambda i: (0, 0)),    # w2 (resident)
                pl.BlockSpec((1, D), lambda i: (0, 0)),    # b1 (resident)
                pl.BlockSpec((1, D), lambda i: (0, 0)),    # b2 (resident)
            ],
            out_specs=(pl.BlockSpec((tm, D), lambda i: (i, 0)),
                       pl.BlockSpec((tm, D), lambda i: (i, 0))),
            compiler_params=pltpu.CompilerParams(
                dimension_semantics=("parallel",)),
            cost_estimate=pl.CostEstimate(flops=2 * 2 * B * D * D,
                                          transcendentals=0,
                                          bytes_accessed=bytes_accessed),
        )(book_user_embeddings, movie_user_embeddings, w1t, w2t, b1r, b2r)
        return book_out, movie_out

    # Unbalanced batches: each bridge runs with its exact shape — no padding
    # the smaller batch up to max(Bb, Bm), no wasted DMA or grid steps.
    book_out = _linear_pallas(book_user_embeddings, w1t, b1r, out_dtype, tm_max)
    movie_out = _linear_pallas(movie_user_embeddings, w2t, b2r, out_dtype, tm_max)
    return book_out, movie_out


def _orthogonal(key, n, dtype=jnp.float32):
    """Deterministic orthogonal init (QR of a Gaussian), mirrors
    torch.nn.init.orthogonal_ for a square matrix."""
    a = jax.random.normal(key, (n, n), dtype=jnp.float32)
    q, r = jnp.linalg.qr(a)
    d = jnp.diagonal(r)
    d = jnp.where(d == 0, 1.0, jnp.sign(d))
    q = q * d[None, :]
    return q.astype(dtype)


if __name__ == "__main__":
    latent_dim = 128   # lane-dense feature dim (multiple of 128)
    batch = 16

    key = jax.random.PRNGKey(0)
    k_w1, k_w2, k_b1, k_b2, k_x1, k_x2 = jax.random.split(key, 6)

    # Parameters (deterministic, in-script), PyTorch Linear conventions.
    w1 = _orthogonal(k_w1, latent_dim)                       # bridge1.weight [out, in]
    w2 = _orthogonal(k_w2, latent_dim)                       # bridge2.weight [out, in]
    bound = 1.0 / jnp.sqrt(jnp.float32(latent_dim))
    b1 = jax.random.uniform(k_b1, (latent_dim,), minval=-bound, maxval=bound)
    b2 = jax.random.uniform(k_b2, (latent_dim,), minval=-bound, maxval=bound)

    # Example inputs.
    book_user_embeddings = jax.random.normal(k_x1, (batch, latent_dim), jnp.float32)
    movie_user_embeddings = jax.random.normal(k_x2, (batch, latent_dim), jnp.float32)

    book_out, movie_out = share_layer(
        book_user_embeddings, movie_user_embeddings, w1, b1, w2, b2
    )
    jax.block_until_ready((book_out, movie_out))

    # Reference: same math as torch.nn.Linear, with the same in-kernel bf16
    # operand cast (f32 accumulation + f32 bias).
    def ref_linear(x, w, b):
        xb = x.astype(jnp.bfloat16).astype(jnp.float32)
        wb = w.astype(jnp.bfloat16).astype(jnp.float32)
        return xb @ wb.T + b.reshape(1, -1)

    ref_book = ref_linear(book_user_embeddings, w1, b1)
    ref_movie = ref_linear(movie_user_embeddings, w2, b2)
    assert book_out.shape == (batch, latent_dim)
    assert movie_out.shape == (batch, latent_dim)
    assert jnp.allclose(book_out, ref_book, atol=2e-3, rtol=2e-3), "bridge1 mismatch"
    assert jnp.allclose(movie_out, ref_movie, atol=2e-3, rtol=2e-3), "bridge2 mismatch"

    print("KERNEL_OK")
</pallas_src>

<mosaic_0001>
module attributes {stable_mosaic.version = 11 : i64} {
  func.func @_fused_share_kernel(%arg0: i32, %arg1: memref<16x128xf32, #tpu.memory_space<vmem>>, %arg2: memref<16x128xf32, #tpu.memory_space<vmem>>, %arg3: memref<128x128xf32, #tpu.memory_space<vmem>>, %arg4: memref<128x128xf32, #tpu.memory_space<vmem>>, %arg5: memref<1x128xf32, #tpu.memory_space<vmem>>, %arg6: memref<1x128xf32, #tpu.memory_space<vmem>>, %arg7: memref<16x128xf32, #tpu.memory_space<vmem>>, %arg8: memref<16x128xf32, #tpu.memory_space<vmem>>) attributes {dimension_semantics = [#tpu.dimension_semantics<parallel>], iteration_bounds = array<i64: 1>, scalar_prefetch = 0 : i64, scratch_operands = 0 : i64, tpu.core_type = #tpu.core_type<tc>, window_params = [{transform_indices = @transform_0, window_bounds = array<i64: 16, 128>}, {transform_indices = @transform_1, window_bounds = array<i64: 16, 128>}, {pipeline_mode = #tpu.pipeline_mode<synchronous>, transform_indices = @transform_2, window_bounds = array<i64: 128, 128>}, {pipeline_mode = #tpu.pipeline_mode<synchronous>, transform_indices = @transform_3, window_bounds = array<i64: 128, 128>}, {pipeline_mode = #tpu.pipeline_mode<synchronous>, transform_indices = @transform_4, window_bounds = array<i64: 1, 128>}, {pipeline_mode = #tpu.pipeline_mode<synchronous>, transform_indices = @transform_5, window_bounds = array<i64: 1, 128>}, {transform_indices = @transform_6, window_bounds = array<i64: 16, 128>}, {transform_indices = @transform_7, window_bounds = array<i64: 16, 128>}]} {
    %c0 = arith.constant 0 : index
    %c0_0 = arith.constant 0 : index
    %0 = vector.load %arg1[%c0, %c0_0] : memref<16x128xf32, #tpu.memory_space<vmem>>, vector<16x128xf32>
    %1 = arith.truncf %0 : vector<16x128xf32> to vector<16x128xbf16>
    %c0_1 = arith.constant 0 : index
    %c0_2 = arith.constant 0 : index
    %2 = vector.load %arg3[%c0_1, %c0_2] : memref<128x128xf32, #tpu.memory_space<vmem>>, vector<128x128xf32>
    %3 = arith.truncf %2 : vector<128x128xf32> to vector<128x128xbf16>
    %cst = arith.constant dense<0.000000e+00> : vector<16x128xf32>
    %4 = tpu.matmul %1, %3, %cst {dimension_numbers = #tpu.dot_dimension_numbers<[1], [0], [0], [1], [0, 0, 1, 1], [], []>} : vector<16x128xbf16>, vector<128x128xbf16>, vector<16x128xf32> -> vector<16x128xf32>
    %c0_3 = arith.constant 0 : index
    %c0_4 = arith.constant 0 : index
    %5 = vector.load %arg5[%c0_3, %c0_4] : memref<1x128xf32, #tpu.memory_space<vmem>>, vector<1x128xf32>
    %6 = vector.broadcast %5 : vector<1x128xf32> to vector<16x128xf32>
    %7 = arith.addf %4, %6 : vector<16x128xf32>
    %c0_5 = arith.constant 0 : index
    %c0_6 = arith.constant 0 : index
    %8 = vector.load %arg7[%c0_5, %c0_6] : memref<16x128xf32, #tpu.memory_space<vmem>>, vector<16x128xf32>
    tpu.vector_store %arg7[%c0_5, %c0_6], %7 {strides = array<i32>} : memref<16x128xf32, #tpu.memory_space<vmem>>, vector<16x128xf32>,
    %c0_7 = arith.constant 0 : index
    %c0_8 = arith.constant 0 : index
    %9 = vector.load %arg2[%c0_7, %c0_8] : memref<16x128xf32, #tpu.memory_space<vmem>>, vector<16x128xf32>
    %10 = arith.truncf %9 : vector<16x128xf32> to vector<16x128xbf16>
    %c0_9 = arith.constant 0 : index
    %c0_10 = arith.constant 0 : index
    %11 = vector.load %arg4[%c0_9, %c0_10] : memref<128x128xf32, #tpu.memory_space<vmem>>, vector<128x128xf32>
    %12 = arith.truncf %11 : vector<128x128xf32> to vector<128x128xbf16>
    %cst_11 = arith.constant dense<0.000000e+00> : vector<16x128xf32>
    %13 = tpu.matmul %10, %12, %cst_11 {dimension_numbers = #tpu.dot_dimension_numbers<[1], [0], [0], [1], [0, 0, 1, 1], [], []>} : vector<16x128xbf16>, vector<128x128xbf16>, vector<16x128xf32> -> vector<16x128xf32>
    %c0_12 = arith.constant 0 : index
    %c0_13 = arith.constant 0 : index
    %14 = vector.load %arg6[%c0_12, %c0_13] : memref<1x128xf32, #tpu.memory_space<vmem>>, vector<1x128xf32>
    %15 = vector.broadcast %14 : vector<1x128xf32> to vector<16x128xf32>
    %16 = arith.addf %13, %15 : vector<16x128xf32>
    %c0_14 = arith.constant 0 : index
    %c0_15 = arith.constant 0 : index
    %17 = vector.load %arg8[%c0_14, %c0_15] : memref<16x128xf32, #tpu.memory_space<vmem>>, vector<16x128xf32>
    tpu.vector_store %arg8[%c0_14, %c0_15], %16 {strides = array<i32>} : memref<16x128xf32, #tpu.memory_space<vmem>>, vector<16x128xf32>,
    return
  }
  func.func @transform_0(%arg0: i32) -> (i32, i32) {
    %c0_i32 = arith.constant 0 : i32
    %c0_i32_0 = arith.constant 0 : i32
    return %arg0, %c0_i32 : i32, i32
  }
  func.func @transform_1(%arg0: i32) -> (i32, i32) {
    %c0_i32 = arith.constant 0 : i32
    %c0_i32_0 = arith.constant 0 : i32
    return %arg0, %c0_i32 : i32, i32
  }
  func.func @transform_2(%arg0: i32) -> (i32, i32) {
    %c0_i32 = arith.constant 0 : i32
    %c0_i32_0 = arith.constant 0 : i32
    %c0_i32_1 = arith.constant 0 : i32
    return %c0_i32, %c0_i32_0 : i32, i32
  }
  func.func @transform_3(%arg0: i32) -> (i32, i32) {
    %c0_i32 = arith.constant 0 : i32
    %c0_i32_0 = arith.constant 0 : i32
    %c0_i32_1 = arith.constant 0 : i32
    return %c0_i32, %c0_i32_0 : i32, i32
  }
  func.func @transform_4(%arg0: i32) -> (i32, i32) {
    %c0_i32 = arith.constant 0 : i32
    %c0_i32_0 = arith.constant 0 : i32
    %c0_i32_1 = arith.constant 0 : i32
    return %c0_i32, %c0_i32_0 : i32, i32
  }
  func.func @transform_5(%arg0: i32) -> (i32, i32) {
    %c0_i32 = arith.constant 0 : i32
    %c0_i32_0 = arith.constant 0 : i32
    %c0_i32_1 = arith.constant 0 : i32
    return %c0_i32, %c0_i32_0 : i32, i32
  }
  func.func @transform_6(%arg0: i32) -> (i32, i32) {
    %c0_i32 = arith.constant 0 : i32
    %c0_i32_0 = arith.constant 0 : i32
    return %arg0, %c0_i32 : i32, i32
  }
  func.func @transform_7(%arg0: i32) -> (i32, i32) {
    %c0_i32 = arith.constant 0 : i32
    %c0_i32_0 = arith.constant 0 : i32
    return %arg0, %c0_i32 : i32, i32
  }
}

</mosaic_0001>

<bundles_post_ra>
// kernel: share_layer.1
= control target key start
LH: loop header
LB: loop body
LE: loop exit
PB: predicated region body
PF: predicated region fallthrough
CT: control target
= control target key end

     0   :  { %13 = vsyncpa [#allocation3], 0  ;;  %s379_s0 = inlined_call_operand.vmem [shape: f32[16,128], index: 0, kind: input, shape index: {}]   ;;  %s380_s1 = inlined_call_operand.vmem [shape: f32[16,128], index: 1, kind: input, shape index: {}]   ;;  %s381_s2 = inlined_call_operand.vmem [shape: f32[128,128], index: 2, kind: input, shape index: {}]   ;;  %s382_s3 = inlined_call_operand.vmem [shape: f32[128,128], index: 3, kind: input, shape index: {}]   ;;  %s383_s4 = inlined_call_operand.vmem [shape: f32[1,128], index: 4, kind: input, shape index: {}]   ;;  %s384_s5 = inlined_call_operand.vmem [shape: f32[1,128], index: 5, kind: input, shape index: {}]   ;;  %s385_s6 = inlined_call_operand.hbm [shape: f32[16,128], index: 6, kind: output, shape index: {0}]   ;;  %s386_s7 = inlined_call_operand.hbm [shape: f32[16,128], index: 7, kind: output, shape index: {1}]  }
   0x1   :  { %v44_v0 = vld [vmem:[%s381_s2 + $0x70] sm:$0xff]  ;;  %v45_v1 = vld [vmem:[%s381_s2 + $0x78] sm:$0xff]  ;;  %v42_v5 = vld [vmem:[%s381_s2 + $0x60] sm:$0xff] }
   0x2   :  { %v91_v2 = vld [vmem:[%s382_s3 + $0x70] sm:$0xff]  ;;  %v53_v3 = vpack.c.bf16 %v45_v1, %v44_v0  ;;  %v92_v4 = vld [vmem:[%s382_s3 + $0x78] sm:$0xff]  ;;  %v43_v6 = vld [vmem:[%s381_s2 + $0x68] sm:$0xff] }
   0x3   :  { %v100_v7 = vpack.c.bf16 %v92_v4, %v91_v2  ;;  %v89_v8 = vld [vmem:[%s382_s3 + $0x60] sm:$0xff]  ;;  %v90_v9 = vld [vmem:[%s382_s3 + $0x68] sm:$0xff]  ;;  %v52_v10 = vpack.c.bf16 %v43_v6, %v42_v5  ;;  %v40_v12 = vld [vmem:[%s381_s2 + $0x50] sm:$0xff] }
   0x4   :  { %58 = vmatpush.bf16.msra.mxu0 %v53_v3  ;;  %v99_v11 = vpack.c.bf16 %v90_v9, %v89_v8  ;;  %v41_v13 = vld [vmem:[%s381_s2 + $0x58] sm:$0xff]  ;;  %v87_v14 = vld [vmem:[%s382_s3 + $0x50] sm:$0xff]  ;;  %v38_v18 = vld [vmem:[%s381_s2 + $0x40] sm:$0xff] }
   0x5   :  { %105 = vmatpush.bf16.msra.mxu1 %v100_v7  ;;  %v88_v15 = vld [vmem:[%s382_s3 + $0x58] sm:$0xff]  ;;  %v51_v16 = vpack.c.bf16 %v41_v13, %v40_v12  ;;  %v39_v19 = vld [vmem:[%s381_s2 + $0x48] sm:$0xff]  ;;  %v85_v20 = vld [vmem:[%s382_s3 + $0x40] sm:$0xff] }
   0x6   :  { %v98_v17 = vpack.c.bf16 %v88_v15, %v87_v14  ;;  %v86_v21 = vld [vmem:[%s382_s3 + $0x48] sm:$0xff]  ;;  %v50_v22 = vpack.c.bf16 %v39_v19, %v38_v18  ;;  %v36_v23 = vld [vmem:[%s381_s2 + $0x30] sm:$0xff]  ;;  %v37_v25 = vld [vmem:[%s381_s2 + $0x38] sm:$0xff] }
   0x7   :  { %v97_v24 = vpack.c.bf16 %v86_v21, %v85_v20  ;;  %v83_v26 = vld [vmem:[%s382_s3 + $0x30] sm:$0xff]  ;;  %v84_v27 = vld [vmem:[%s382_s3 + $0x38] sm:$0xff] }
   0x8   :  { %59 = vmatpush.bf16.msra.mxu0 %v52_v10 }
   0x9   :  { %106 = vmatpush.bf16.msra.mxu1 %v99_v11 }
   0xc   :  { %60 = vmatpush.bf16.msra.mxu0 %v51_v16 }
   0xd   :  { %107 = vmatpush.bf16.msra.mxu1 %v98_v17 }
   0xe   :  { %14 = vsyncpa [#allocation5], 0  ;;  %v49_v28 = vpack.c.bf16 %v37_v25, %v36_v23  ;;  %v96_v29 = vpack.c.bf16 %v84_v27, %v83_v26  ;;  %v34_v30 = vld [vmem:[%s381_s2 + $0x20] sm:$0xff]  ;;  %v35_v31 = vld [vmem:[%s381_s2 + $0x28] sm:$0xff]  ;;  %s127_s8 = sshll.u32 %s385_s6, 4  ;;  %s216_s9 = smov [#allocation4]   ;;  %s128_s8 = int_to_ptr.hbm [resolvable:$true] %s127_s8 }
   0xf   :  { %v81_v32 = vld [vmem:[%s382_s3 + $0x20] sm:$0xff]  ;;  %v82_v33 = vld [vmem:[%s382_s3 + $0x28] sm:$0xff]  ;;  %v48_v34 = vpack.c.bf16 %v35_v31, %v34_v30  ;;  %v32_v36 = vld [vmem:[%s381_s2 + $0x10] sm:$0xff]  ;;  %s138_s10 = sshll.u32 %s216_s9, 4  ;;  %s140_s12 = sshll.u32 %s386_s7, 4  ;;  %s139_s10 = int_to_ptr.vmem [resolvable:$true] %s138_s10  ;;  %s141_s12 = int_to_ptr.hbm [resolvable:$true] %s140_s12 }
  0x10   :  { %61 = vmatpush.bf16.msra.mxu0 %v50_v22  ;;  %v95_v35 = vpack.c.bf16 %v82_v33, %v81_v32  ;;  %v33_v37 = vld [vmem:[%s381_s2 + $0x18] sm:$0xff]  ;;  %v79_v38 = vld [vmem:[%s382_s3 + $0x10] sm:$0xff]  ;;  %v30_v42 = vld [vmem:[%s381_s2] sm:$0xff]  ;;  %s218_s13 = smov 8  }
  0x11   :  { %108 = vmatpush.bf16.msra.mxu1 %v97_v24  ;;  %v80_v39 = vld [vmem:[%s382_s3 + $0x18] sm:$0xff]  ;;  %v47_v40 = vpack.c.bf16 %v33_v37, %v32_v36  ;;  %v31_v43 = vld [vmem:[%s381_s2 + $0x8] sm:$0xff]  ;;  %v77_v44 = vld [vmem:[%s382_s3] sm:$0xff] }
  0x12   :  { %v94_v41 = vpack.c.bf16 %v80_v39, %v79_v38  ;;  %v78_v45 = vld [vmem:[%s382_s3 + $0x8] sm:$0xff]  ;;  %v46_v46 = vpack.c.bf16 %v31_v43, %v30_v42  ;;  %v27_v47 = vld [vmem:[%s379_s0] sm:$0xff] }
  0x13   :  { %v28_v48 = vld [vmem:[%s379_s0 + $0x8] sm:$0xff]  ;;  %v93_v49 = vpack.c.bf16 %v78_v45, %v77_v44  ;;  %v74_v50 = vld [vmem:[%s380_s1] sm:$0xff] }
  0x14   :  { %62 = vmatpush.bf16.msra.mxu0 %v49_v28  ;;  %v75_v51 = vld [vmem:[%s380_s1 + $0x8] sm:$0xff]  ;;  %v29_v52 = vpack.c.bf16 %v28_v48, %v27_v47  ;;  %v161_v54 = vld [vmem:[%s383_s4] ss:$0 sm:$0xff]  ;;  %s215_s1 = smov [#allocation2]  }
  0x15   :  { %109 = vmatpush.bf16.msra.mxu1 %v96_v29  ;;  %v76_v53 = vpack.c.bf16 %v75_v51, %v74_v50  ;;  %v162_v55 = vld [vmem:[%s384_s5] ss:$0 sm:$0xff]  ;;  %s125_s28 = sshll.u32 %s215_s1, 4  ;;  %s217_s5 = smov 128   ;;  %s126_s28 = int_to_ptr.vmem [resolvable:$true] %s125_s28 }
  0x18   :  { %63 = vmatpush.bf16.msra.mxu0 %v48_v34 }
  0x19   :  { %110 = vmatpush.bf16.msra.mxu1 %v95_v35 }
  0x1c   :  { %64 = vmatpush.bf16.msra.mxu0 %v47_v40 }
  0x1d   :  { %111 = vmatpush.bf16.msra.mxu1 %v94_v41 }
  0x20   :  { %65 = vmatpush.bf16.msra.mxu0 %v46_v46 }
  0x21   :  { %112 = vmatpush.bf16.msra.mxu1 %v93_v49 }
  0x23   :  { %66 = vmatmul.bf16.vlgmr.msra.gmra.mxu0 %v29_v52 }
  0x24   :  { %113 = vmatmul.bf16.vlgmr.msra.gmra.mxu1 %v76_v53 }
  0xa0   :  { %v67_v56 = vpop.f32.mrf.mxu0 }
  0xa1   :  { %v68_v57 = vadd.f32 %v161_v54, %v67_v56  ;;  %v114_v58 = vpop.f32.mrf.mxu1 }
  0xa2   :  { %v115_v59 = vadd.f32 %v162_v55, %v114_v58 }
  0xa3   :  { %72 = vst [vmem:[#allocation2] sm:$0xff] %v68_v57 }
  0xa4   :  { %119 = vst [vmem:[#allocation4] sm:$0xff] %v115_v59 }
  0xa8   :  { %v69_v60 = vpop.f32.mrf.mxu0 }
  0xa9   :  { %v70_v61 = vadd.f32 %v161_v54, %v69_v60  ;;  %v116_v62 = vpop.f32.mrf.mxu1 }
  0xaa   :  { %v117_v63 = vadd.f32 %v162_v55, %v116_v62 }
  0xab   :  { %73 = vst [vmem:[#allocation2 + $0x8] sm:$0xff] %v70_v61 }
  0xac   :  { %120 = vst [vmem:[#allocation4 + $0x8] sm:$0xff] %v117_v63  ;;  %133 = dma.vmem_to_hbm [thread:$0]  %s126_s28, 256, %s128_s8, [#allocation3], %s217_s5, %s217_s5, %s218_s13  }
  0xad   :  { %146 = dma.vmem_to_hbm [thread:$0]  %s139_s10, 256, %s141_s12, [#allocation5], %s217_s5, %s217_s5, %s218_s13  }
  0xae   :  { %211 = dma.done.wait [#allocation3], 256  }
  0xaf   :  { %212 = vsyncadd [#allocation3], 4294967040 }
  0xb0   :  { %213 = dma.done.wait [#allocation5], 256  }
  0xb1   :  { %214 = vsyncadd [#allocation5], 4294967040 }
  0xb2   :  { %155 = vsyncpa [#allocation3], 1 }
  0xb3   :  { %156 = vsyncpa [#allocation5], 1 }

</bundles_post_ra>
